<compile_context>
chip_gen: v7x
topology: tpu7x:2x2x1
jax: 0.10.0
libtpu: 0.0.40
codegen_flags: <defaults>
</compile_context>

<pallas_src>
import math
import functools

import jax
import jax.numpy as jnp
from jax.experimental import pallas as pl
from jax.experimental.pallas import tpu as pltpu


# ----------------------------------------------------------------------------
# Fused forward kernel.
#
# act_ref : (4, Bp, H)  [0]=state (zero-padded to H cols), [1]=extra (padded),
#                       [2]=h, [3]=c
# w_ref   : (14, H, H)  [0]=W1^T, [1..4]=Wih_x per gate, [5..8]=Wih_extra per
#                       gate (rows zero-padded E->H), [9..12]=Whh per gate,
#                       [13]=fused head [W_actor^T | W_critic^T | 0] (cols
#                       padded A+1 -> H)
# b_ref   : (6, 1, H)   [0]=b1, [1..4]=b_ih+b_hh per gate, [5]=fused head bias
# out_ref : (3, Bp, H)  [0]=[policy | V | 0], [1]=h', [2]=c'
# ----------------------------------------------------------------------------
def actor_critic_kernel(act_ref, w_ref, b_ref, out_ref, *, action_size):
    state = act_ref[0]
    extra = act_ref[1]
    h0 = act_ref[2]
    c0 = act_ref[3]

    # fc1 + ReLU  (padded state cols hit zero weight rows -> exact)
    a1 = jnp.dot(state, w_ref[0], preferred_element_type=jnp.float32) + b_ref[0]
    a1 = jnp.maximum(a1, 0.0)

    # LSTMCell gates, one (B, H) result per gate (PyTorch order i, f, g, o).
    # Per-gate weight blocks avoid any lane slicing of a (B, 4H) tensor.
    pre = []
    for g in range(4):
        p = (
            jnp.dot(a1, w_ref[1 + g], preferred_element_type=jnp.float32)
            + jnp.dot(extra, w_ref[5 + g], preferred_element_type=jnp.float32)
            + jnp.dot(h0, w_ref[9 + g], preferred_element_type=jnp.float32)
            + b_ref[1 + g]
        )
        pre.append(p)
    i_g = jax.nn.sigmoid(pre[0])
    f_g = jax.nn.sigmoid(pre[1])
    g_g = jnp.tanh(pre[2])
    o_g = jax.nn.sigmoid(pre[3])

    c_new = f_g * c0 + i_g * g_g
    h_new = o_g * jnp.tanh(c_new)

    # Fused actor+critic head: logits[:, :A] are actor logits, logits[:, A] is
    # V, remaining padded columns are zero.  Masked softmax over the first A
    # lanes; V is passed through unchanged.
    logits = jnp.dot(h_new, w_ref[13], preferred_element_type=jnp.float32) + b_ref[5]
    col = jax.lax.broadcasted_iota(jnp.int32, logits.shape, 1)
    is_act = col < action_size
    m = jnp.max(jnp.where(is_act, logits, -jnp.inf), axis=-1, keepdims=True)
    e = jnp.where(is_act, jnp.exp(logits - m), 0.0)
    denom = jnp.sum(e, axis=-1, keepdims=True)
    probs = e * pl.reciprocal(denom, approx=True)
    # clamp(max=1-1e-20) of the original module is a no-op in fp32 -> dropped.

    out_ref[0] = jnp.where(is_act, probs, logits)
    out_ref[1] = h_new
    out_ref[2] = c_new


# ----------------------------------------------------------------------------
# Parameter init (mirrors the PyTorch module) and one-time packing.
# ----------------------------------------------------------------------------
def xavier_uniform(key, shape):
    fan_out, fan_in = shape
    a = math.sqrt(6.0 / (fan_in + fan_out))
    return jax.random.uniform(key, shape, jnp.float32, -a, a)


def init_actor_critic_params(key, state_size, action_size, hidden_size, no_noise=False):
    ks = jax.random.split(key, 8)
    lstm_in = hidden_size + action_size + 2
    p = {
        "fc1_w": xavier_uniform(ks[0], (hidden_size, state_size)),
        "fc1_b": jnp.zeros((hidden_size,), jnp.float32),
        "w_ih": xavier_uniform(ks[1], (4 * hidden_size, lstm_in)),
        "b_ih": jnp.zeros((4 * hidden_size,), jnp.float32),
        "w_hh": xavier_uniform(ks[2], (4 * hidden_size, hidden_size)),
        "b_hh": jnp.zeros((4 * hidden_size,), jnp.float32),
    }
    if no_noise:
        p["actor_w"] = xavier_uniform(ks[3], (action_size, hidden_size))
        p["actor_b"] = jnp.zeros((action_size,), jnp.float32)
        p["critic_w"] = xavier_uniform(ks[4], (1, hidden_size))
        p["critic_b"] = jnp.zeros((1,), jnp.float32)
    else:
        # NoisyLinear.reset_parameters(): uniform(+-sqrt(3/in)), bias 0,
        # sigma_weight = 0.0017, sigma_bias = 0, epsilon buffers = 0.
        bound = math.sqrt(3.0 / hidden_size)
        p["actor_w"] = jax.random.uniform(ks[5], (action_size, hidden_size), jnp.float32, -bound, bound)
        p["actor_b"] = jnp.zeros((action_size,), jnp.float32)
        p["actor_sigma_w"] = jnp.full((action_size, hidden_size), 0.0017, jnp.float32)
        p["actor_sigma_b"] = jnp.zeros((action_size,), jnp.float32)
        p["actor_eps_w"] = jnp.zeros((action_size, hidden_size), jnp.float32)
        p["actor_eps_b"] = jnp.zeros((action_size,), jnp.float32)
        p["critic_w"] = jax.random.uniform(ks[6], (1, hidden_size), jnp.float32, -bound, bound)
        p["critic_b"] = jnp.zeros((1,), jnp.float32)
        p["critic_sigma_w"] = jnp.full((1, hidden_size), 0.0017, jnp.float32)
        p["critic_sigma_b"] = jnp.zeros((1,), jnp.float32)
        p["critic_eps_w"] = jnp.zeros((1, hidden_size), jnp.float32)
        p["critic_eps_b"] = jnp.zeros((1,), jnp.float32)
    return p


def pack_actor_critic_params(params, *, state_size, action_size, hidden_size, no_noise=False):
    """Call ONCE per parameter update (not per forward step).

    Builds the two weight slabs consumed by the kernel: effective noisy-head
    weights (W + sigma*eps), pre-transposed to (in, out), split per gate, and
    zero-padded so every block is (H, H).
    """
    S, A, H = state_size, action_size, hidden_size
    E = A + 2
    assert S <= H and E <= H and A + 1 <= H, "packing assumes S, A+2, A+1 <= hidden_size"

    if no_noise:
        wa_eff, ba_eff = params["actor_w"], params["actor_b"]
        wc_eff, bc_eff = params["critic_w"], params["critic_b"]
    else:
        wa_eff = params["actor_w"] + params["actor_sigma_w"] * params["actor_eps_w"]
        ba_eff = params["actor_b"] + params["actor_sigma_b"] * params["actor_eps_b"]
        wc_eff = params["critic_w"] + params["critic_sigma_w"] * params["critic_eps_w"]
        bc_eff = params["critic_b"] + params["critic_sigma_b"] * params["critic_eps_b"]

    def pad_rows(w):
        return jnp.pad(w, ((0, H - w.shape[0]), (0, 0)))

    w1_t = params["fc1_w"].T                     # (S, H)
    w_ih_t = params["w_ih"].T                    # (H+E, 4H)
    wih_x = w_ih_t[:H, :]                        # (H, 4H)
    wih_e = w_ih_t[H:, :]                        # (E, 4H)
    whh_t = params["w_hh"].T                     # (H, 4H)

    blocks = [pad_rows(w1_t)]
    blocks += [wih_x[:, g * H:(g + 1) * H] for g in range(4)]
    blocks += [pad_rows(wih_e[:, g * H:(g + 1) * H]) for g in range(4)]
    blocks += [whh_t[:, g * H:(g + 1) * H] for g in range(4)]
    whead = jnp.concatenate([wa_eff.T, wc_eff.T], axis=1)          # (H, A+1)
    blocks.append(jnp.pad(whead, ((0, 0), (0, H - (A + 1)))))      # (H, H)
    w_pack = jnp.stack(blocks, axis=0).astype(jnp.float32)         # (14, H, H)

    b1 = params["fc1_b"]
    bg = (params["b_ih"] + params["b_hh"]).reshape(4, H)
    bhead = jnp.pad(jnp.concatenate([ba_eff, bc_eff]), (0, H - (A + 1)))
    b_pack = jnp.concatenate([b1[None, :], bg, bhead[None, :]], axis=0)
    b_pack = b_pack.reshape(6, 1, H).astype(jnp.float32)

    return {"w_pack": w_pack, "b_pack": b_pack}


# ----------------------------------------------------------------------------
# Per-step forward wrapper (pure layout plumbing + one pallas_call).
# ----------------------------------------------------------------------------
def actor_critic_forward(packed, x, h, *, state_size, action_size, hidden_size):
    """x: (B, state_size + action_size + 2); h = (h0, c0) each (B, hidden)."""
    h0, c0 = h
    B = x.shape[0]
    S, A, H = state_size, action_size, hidden_size
    E = A + 2
    Bp = max(8, ((B + 7) // 8) * 8)   # pad batch to fp32 sublane count

    # Pack activations into one lane-dense slab: (4, Bp, H).
    act = jnp.zeros((4, Bp, H), jnp.float32)
    act = act.at[0, :B, :S].set(x[:, :S].astype(jnp.float32))
    act = act.at[1, :B, :E].set(x[:, S:].astype(jnp.float32))
    act = act.at[2, :B, :].set(h0.astype(jnp.float32))
    act = act.at[3, :B, :].set(c0.astype(jnp.float32))

    vmem = pl.BlockSpec(memory_space=pltpu.MemorySpace.VMEM)
    out = pl.pallas_call(
        functools.partial(actor_critic_kernel, action_size=A),
        out_shape=jax.ShapeDtypeStruct((3, Bp, H), jnp.float32),
        in_specs=[vmem, vmem, vmem],
        out_specs=vmem,
    )(act, packed["w_pack"], packed["b_pack"])

    head = out[0, :B]
    policy = head[:, :A]
    V = head[:, A:A + 1]
    h_new = out[1, :B]
    c_new = out[2, :B]
    return policy, V, (h_new, c_new)


# ----------------------------------------------------------------------------
# Pure-JAX reference (for correctness check).
# ----------------------------------------------------------------------------
def reference_forward(params, x, h, *, state_size, action_size, hidden_size, no_noise=False):
    h0, c0 = h
    H = hidden_size
    state = x[:, :state_size]
    extra = x[:, state_size:]
    a1 = jax.nn.relu(state @ params["fc1_w"].T + params["fc1_b"])
    inp = jnp.concatenate([a1, extra], axis=1)
    gates = inp @ params["w_ih"].T + params["b_ih"] + h0 @ params["w_hh"].T + params["b_hh"]
    i_g = jax.nn.sigmoid(gates[:, :H])
    f_g = jax.nn.sigmoid(gates[:, H:2 * H])
    g_g = jnp.tanh(gates[:, 2 * H:3 * H])
    o_g = jax.nn.sigmoid(gates[:, 3 * H:])
    c_new = f_g * c0 + i_g * g_g
    h_new = o_g * jnp.tanh(c_new)
    if no_noise:
        wa, ba = params["actor_w"], params["actor_b"]
        wc, bc = params["critic_w"], params["critic_b"]
    else:
        wa = params["actor_w"] + params["actor_sigma_w"] * params["actor_eps_w"]
        ba = params["actor_b"] + params["actor_sigma_b"] * params["actor_eps_b"]
        wc = params["critic_w"] + params["critic_sigma_w"] * params["critic_eps_w"]
        bc = params["critic_b"] + params["critic_sigma_b"] * params["critic_eps_b"]
    policy = jnp.minimum(jax.nn.softmax(h_new @ wa.T + ba, axis=1), 1.0 - 1e-20)
    V = h_new @ wc.T + bc
    return policy, V, (h_new, c_new)


if __name__ == "__main__":
    import numpy as np

    B = 4            # batch (wrapper pads to 8 sublanes internally)
    STATE = 16       # observation_space.shape[0]
    ACTIONS = 4      # action_space.n
    HIDDEN = 32      # hidden_size
    NO_NOISE = False

    key = jax.random.PRNGKey(0)
    k_params, k_x, k_h, k_c = jax.random.split(key, 4)

    params = init_actor_critic_params(k_params, STATE, ACTIONS, HIDDEN, no_noise=NO_NOISE)
    packed = pack_actor_critic_params(
        params, state_size=STATE, action_size=ACTIONS, hidden_size=HIDDEN, no_noise=NO_NOISE)

    x = jax.random.normal(k_x, (B, STATE + ACTIONS + 2), jnp.float32)
    h0 = jax.random.normal(k_h, (B, HIDDEN), jnp.float32)
    c0 = jax.random.normal(k_c, (B, HIDDEN), jnp.float32)

    policy, V, (h_new, c_new) = actor_critic_forward(
        packed, x, (h0, c0),
        state_size=STATE, action_size=ACTIONS, hidden_size=HIDDEN)
    jax.block_until_ready((policy, V, h_new, c_new))

    # Sanity check against pure-JAX reference.
    p_ref, v_ref, (h_ref, c_ref) = reference_forward(
        params, x, (h0, c0),
        state_size=STATE, action_size=ACTIONS, hidden_size=HIDDEN, no_noise=NO_NOISE)
    # policy goes through pl.reciprocal(approx=True) -> slightly looser tol.
    np.testing.assert_allclose(np.asarray(policy), np.asarray(p_ref), rtol=2e-3, atol=2e-3)
    np.testing.assert_allclose(np.asarray(V), np.asarray(v_ref), rtol=1e-5, atol=1e-5)
    np.testing.assert_allclose(np.asarray(h_new), np.asarray(h_ref), rtol=1e-5, atol=1e-5)
    np.testing.assert_allclose(np.asarray(c_new), np.asarray(c_ref), rtol=1e-5, atol=1e-5)

    print("KERNEL_OK")
</pallas_src>

<mosaic_0001>
module attributes {stable_mosaic.version = 11 : i64} {
  func.func @actor_critic_kernel(%arg0: memref<4x8x32xf32, #tpu.memory_space<vmem>>, %arg1: memref<14x32x32xf32, #tpu.memory_space<vmem>>, %arg2: memref<6x1x32xf32, #tpu.memory_space<vmem>>, %arg3: memref<3x8x32xf32, #tpu.memory_space<vmem>>) attributes {dimension_semantics = [], scalar_prefetch = 0 : i64, scratch_operands = 0 : i64, tpu.core_type = #tpu.core_type<tc>} {
    %c0 = arith.constant 0 : index
    %c0_0 = arith.constant 0 : index
    %c0_1 = arith.constant 0 : index
    %0 = vector.load %arg0[%c0, %c0_0, %c0_1] : memref<4x8x32xf32, #tpu.memory_space<vmem>>, vector<1x8x32xf32>
    %1 = vector.shape_cast %0 : vector<1x8x32xf32> to vector<8x32xf32>
    %c1 = arith.constant 1 : index
    %c0_2 = arith.constant 0 : index
    %c0_3 = arith.constant 0 : index
    %2 = vector.load %arg0[%c1, %c0_2, %c0_3] : memref<4x8x32xf32, #tpu.memory_space<vmem>>, vector<1x8x32xf32>
    %3 = vector.shape_cast %2 : vector<1x8x32xf32> to vector<8x32xf32>
    %c2 = arith.constant 2 : index
    %c0_4 = arith.constant 0 : index
    %c0_5 = arith.constant 0 : index
    %4 = vector.load %arg0[%c2, %c0_4, %c0_5] : memref<4x8x32xf32, #tpu.memory_space<vmem>>, vector<1x8x32xf32>
    %5 = vector.shape_cast %4 : vector<1x8x32xf32> to vector<8x32xf32>
    %c3 = arith.constant 3 : index
    %c0_6 = arith.constant 0 : index
    %c0_7 = arith.constant 0 : index
    %6 = vector.load %arg0[%c3, %c0_6, %c0_7] : memref<4x8x32xf32, #tpu.memory_space<vmem>>, vector<1x8x32xf32>
    %7 = vector.shape_cast %6 : vector<1x8x32xf32> to vector<8x32xf32>
    %c0_8 = arith.constant 0 : index
    %c0_9 = arith.constant 0 : index
    %c0_10 = arith.constant 0 : index
    %8 = vector.load %arg1[%c0_8, %c0_9, %c0_10] : memref<14x32x32xf32, #tpu.memory_space<vmem>>, vector<1x32x32xf32>
    %9 = vector.shape_cast %8 : vector<1x32x32xf32> to vector<32x32xf32>
    %cst = arith.constant dense<0.000000e+00> : vector<8x32xf32>
    %10 = tpu.matmul %1, %9, %cst {dimension_numbers = #tpu.dot_dimension_numbers<[1], [0], [0], [1], [0, 0, 1, 1], [], []>} : vector<8x32xf32>, vector<32x32xf32>, vector<8x32xf32> -> vector<8x32xf32>
    %c0_11 = arith.constant 0 : index
    %c0_12 = arith.constant 0 : index
    %c0_13 = arith.constant 0 : index
    %11 = vector.load %arg2[%c0_11, %c0_12, %c0_13] : memref<6x1x32xf32, #tpu.memory_space<vmem>>, vector<1x1x32xf32>
    %12 = vector.shape_cast %11 : vector<1x1x32xf32> to vector<1x32xf32>
    %13 = vector.broadcast %12 : vector<1x32xf32> to vector<8x32xf32>
    %14 = arith.addf %10, %13 : vector<8x32xf32>
    %cst_14 = arith.constant 0.000000e+00 : f32
    %15 = vector.broadcast %cst_14 : f32 to vector<8x32xf32>
    %16 = arith.maximumf %14, %15 : vector<8x32xf32>
    %c1_15 = arith.constant 1 : index
    %c0_16 = arith.constant 0 : index
    %c0_17 = arith.constant 0 : index
    %17 = vector.load %arg1[%c1_15, %c0_16, %c0_17] : memref<14x32x32xf32, #tpu.memory_space<vmem>>, vector<1x32x32xf32>
    %18 = vector.shape_cast %17 : vector<1x32x32xf32> to vector<32x32xf32>
    %cst_18 = arith.constant dense<0.000000e+00> : vector<8x32xf32>
    %19 = tpu.matmul %16, %18, %cst_18 {dimension_numbers = #tpu.dot_dimension_numbers<[1], [0], [0], [1], [0, 0, 1, 1], [], []>} : vector<8x32xf32>, vector<32x32xf32>, vector<8x32xf32> -> vector<8x32xf32>
    %c5 = arith.constant 5 : index
    %c0_19 = arith.constant 0 : index
    %c0_20 = arith.constant 0 : index
    %20 = vector.load %arg1[%c5, %c0_19, %c0_20] : memref<14x32x32xf32, #tpu.memory_space<vmem>>, vector<1x32x32xf32>
    %21 = vector.shape_cast %20 : vector<1x32x32xf32> to vector<32x32xf32>
    %cst_21 = arith.constant dense<0.000000e+00> : vector<8x32xf32>
    %22 = tpu.matmul %3, %21, %cst_21 {dimension_numbers = #tpu.dot_dimension_numbers<[1], [0], [0], [1], [0, 0, 1, 1], [], []>} : vector<8x32xf32>, vector<32x32xf32>, vector<8x32xf32> -> vector<8x32xf32>
    %23 = arith.addf %19, %22 : vector<8x32xf32>
    %c9 = arith.constant 9 : index
    %c0_22 = arith.constant 0 : index
    %c0_23 = arith.constant 0 : index
    %24 = vector.load %arg1[%c9, %c0_22, %c0_23] : memref<14x32x32xf32, #tpu.memory_space<vmem>>, vector<1x32x32xf32>
    %25 = vector.shape_cast %24 : vector<1x32x32xf32> to vector<32x32xf32>
    %cst_24 = arith.constant dense<0.000000e+00> : vector<8x32xf32>
    %26 = tpu.matmul %5, %25, %cst_24 {dimension_numbers = #tpu.dot_dimension_numbers<[1], [0], [0], [1], [0, 0, 1, 1], [], []>} : vector<8x32xf32>, vector<32x32xf32>, vector<8x32xf32> -> vector<8x32xf32>
    %27 = arith.addf %23, %26 : vector<8x32xf32>
    %c1_25 = arith.constant 1 : index
    %c0_26 = arith.constant 0 : index
    %c0_27 = arith.constant 0 : index
    %28 = vector.load %arg2[%c1_25, %c0_26, %c0_27] : memref<6x1x32xf32, #tpu.memory_space<vmem>>, vector<1x1x32xf32>
    %29 = vector.shape_cast %28 : vector<1x1x32xf32> to vector<1x32xf32>
    %30 = vector.broadcast %29 : vector<1x32xf32> to vector<8x32xf32>
    %31 = arith.addf %27, %30 : vector<8x32xf32>
    %c2_28 = arith.constant 2 : index
    %c0_29 = arith.constant 0 : index
    %c0_30 = arith.constant 0 : index
    %32 = vector.load %arg1[%c2_28, %c0_29, %c0_30] : memref<14x32x32xf32, #tpu.memory_space<vmem>>, vector<1x32x32xf32>
    %33 = vector.shape_cast %32 : vector<1x32x32xf32> to vector<32x32xf32>
    %cst_31 = arith.constant dense<0.000000e+00> : vector<8x32xf32>
    %34 = tpu.matmul %16, %33, %cst_31 {dimension_numbers = #tpu.dot_dimension_numbers<[1], [0], [0], [1], [0, 0, 1, 1], [], []>} : vector<8x32xf32>, vector<32x32xf32>, vector<8x32xf32> -> vector<8x32xf32>
    %c6 = arith.constant 6 : index
    %c0_32 = arith.constant 0 : index
    %c0_33 = arith.constant 0 : index
    %35 = vector.load %arg1[%c6, %c0_32, %c0_33] : memref<14x32x32xf32, #tpu.memory_space<vmem>>, vector<1x32x32xf32>
    %36 = vector.shape_cast %35 : vector<1x32x32xf32> to vector<32x32xf32>
    %cst_34 = arith.constant dense<0.000000e+00> : vector<8x32xf32>
    %37 = tpu.matmul %3, %36, %cst_34 {dimension_numbers = #tpu.dot_dimension_numbers<[1], [0], [0], [1], [0, 0, 1, 1], [], []>} : vector<8x32xf32>, vector<32x32xf32>, vector<8x32xf32> -> vector<8x32xf32>
    %38 = arith.addf %34, %37 : vector<8x32xf32>
    %c10 = arith.constant 10 : index
    %c0_35 = arith.constant 0 : index
    %c0_36 = arith.constant 0 : index
    %39 = vector.load %arg1[%c10, %c0_35, %c0_36] : memref<14x32x32xf32, #tpu.memory_space<vmem>>, vector<1x32x32xf32>
    %40 = vector.shape_cast %39 : vector<1x32x32xf32> to vector<32x32xf32>
    %cst_37 = arith.constant dense<0.000000e+00> : vector<8x32xf32>
    %41 = tpu.matmul %5, %40, %cst_37 {dimension_numbers = #tpu.dot_dimension_numbers<[1], [0], [0], [1], [0, 0, 1, 1], [], []>} : vector<8x32xf32>, vector<32x32xf32>, vector<8x32xf32> -> vector<8x32xf32>
    %42 = arith.addf %38, %41 : vector<8x32xf32>
    %c2_38 = arith.constant 2 : index
    %c0_39 = arith.constant 0 : index
    %c0_40 = arith.constant 0 : index
    %43 = vector.load %arg2[%c2_38, %c0_39, %c0_40] : memref<6x1x32xf32, #tpu.memory_space<vmem>>, vector<1x1x32xf32>
    %44 = vector.shape_cast %43 : vector<1x1x32xf32> to vector<1x32xf32>
    %45 = vector.broadcast %44 : vector<1x32xf32> to vector<8x32xf32>
    %46 = arith.addf %42, %45 : vector<8x32xf32>
    %c3_41 = arith.constant 3 : index
    %c0_42 = arith.constant 0 : index
    %c0_43 = arith.constant 0 : index
    %47 = vector.load %arg1[%c3_41, %c0_42, %c0_43] : memref<14x32x32xf32, #tpu.memory_space<vmem>>, vector<1x32x32xf32>
    %48 = vector.shape_cast %47 : vector<1x32x32xf32> to vector<32x32xf32>
    %cst_44 = arith.constant dense<0.000000e+00> : vector<8x32xf32>
    %49 = tpu.matmul %16, %48, %cst_44 {dimension_numbers = #tpu.dot_dimension_numbers<[1], [0], [0], [1], [0, 0, 1, 1], [], []>} : vector<8x32xf32>, vector<32x32xf32>, vector<8x32xf32> -> vector<8x32xf32>
    %c7 = arith.constant 7 : index
    %c0_45 = arith.constant 0 : index
    %c0_46 = arith.constant 0 : index
    %50 = vector.load %arg1[%c7, %c0_45, %c0_46] : memref<14x32x32xf32, #tpu.memory_space<vmem>>, vector<1x32x32xf32>
    %51 = vector.shape_cast %50 : vector<1x32x32xf32> to vector<32x32xf32>
    %cst_47 = arith.constant dense<0.000000e+00> : vector<8x32xf32>
    %52 = tpu.matmul %3, %51, %cst_47 {dimension_numbers = #tpu.dot_dimension_numbers<[1], [0], [0], [1], [0, 0, 1, 1], [], []>} : vector<8x32xf32>, vector<32x32xf32>, vector<8x32xf32> -> vector<8x32xf32>
    %53 = arith.addf %49, %52 : vector<8x32xf32>
    %c11 = arith.constant 11 : index
    %c0_48 = arith.constant 0 : index
    %c0_49 = arith.constant 0 : index
    %54 = vector.load %arg1[%c11, %c0_48, %c0_49] : memref<14x32x32xf32, #tpu.memory_space<vmem>>, vector<1x32x32xf32>
    %55 = vector.shape_cast %54 : vector<1x32x32xf32> to vector<32x32xf32>
    %cst_50 = arith.constant dense<0.000000e+00> : vector<8x32xf32>
    %56 = tpu.matmul %5, %55, %cst_50 {dimension_numbers = #tpu.dot_dimension_numbers<[1], [0], [0], [1], [0, 0, 1, 1], [], []>} : vector<8x32xf32>, vector<32x32xf32>, vector<8x32xf32> -> vector<8x32xf32>
    %57 = arith.addf %53, %56 : vector<8x32xf32>
    %c3_51 = arith.constant 3 : index
    %c0_52 = arith.constant 0 : index
    %c0_53 = arith.constant 0 : index
    %58 = vector.load %arg2[%c3_51, %c0_52, %c0_53] : memref<6x1x32xf32, #tpu.memory_space<vmem>>, vector<1x1x32xf32>
    %59 = vector.shape_cast %58 : vector<1x1x32xf32> to vector<1x32xf32>
    %60 = vector.broadcast %59 : vector<1x32xf32> to vector<8x32xf32>
    %61 = arith.addf %57, %60 : vector<8x32xf32>
    %c4 = arith.constant 4 : index
    %c0_54 = arith.constant 0 : index
    %c0_55 = arith.constant 0 : index
    %62 = vector.load %arg1[%c4, %c0_54, %c0_55] : memref<14x32x32xf32, #tpu.memory_space<vmem>>, vector<1x32x32xf32>
    %63 = vector.shape_cast %62 : vector<1x32x32xf32> to vector<32x32xf32>
    %cst_56 = arith.constant dense<0.000000e+00> : vector<8x32xf32>
    %64 = tpu.matmul %16, %63, %cst_56 {dimension_numbers = #tpu.dot_dimension_numbers<[1], [0], [0], [1], [0, 0, 1, 1], [], []>} : vector<8x32xf32>, vector<32x32xf32>, vector<8x32xf32> -> vector<8x32xf32>
    %c8 = arith.constant 8 : index
    %c0_57 = arith.constant 0 : index
    %c0_58 = arith.constant 0 : index
    %65 = vector.load %arg1[%c8, %c0_57, %c0_58] : memref<14x32x32xf32, #tpu.memory_space<vmem>>, vector<1x32x32xf32>
    %66 = vector.shape_cast %65 : vector<1x32x32xf32> to vector<32x32xf32>
    %cst_59 = arith.constant dense<0.000000e+00> : vector<8x32xf32>
    %67 = tpu.matmul %3, %66, %cst_59 {dimension_numbers = #tpu.dot_dimension_numbers<[1], [0], [0], [1], [0, 0, 1, 1], [], []>} : vector<8x32xf32>, vector<32x32xf32>, vector<8x32xf32> -> vector<8x32xf32>
    %68 = arith.addf %64, %67 : vector<8x32xf32>
    %c12 = arith.constant 12 : index
    %c0_60 = arith.constant 0 : index
    %c0_61 = arith.constant 0 : index
    %69 = vector.load %arg1[%c12, %c0_60, %c0_61] : memref<14x32x32xf32, #tpu.memory_space<vmem>>, vector<1x32x32xf32>
    %70 = vector.shape_cast %69 : vector<1x32x32xf32> to vector<32x32xf32>
    %cst_62 = arith.constant dense<0.000000e+00> : vector<8x32xf32>
    %71 = tpu.matmul %5, %70, %cst_62 {dimension_numbers = #tpu.dot_dimension_numbers<[1], [0], [0], [1], [0, 0, 1, 1], [], []>} : vector<8x32xf32>, vector<32x32xf32>, vector<8x32xf32> -> vector<8x32xf32>
    %72 = arith.addf %68, %71 : vector<8x32xf32>
    %c4_63 = arith.constant 4 : index
    %c0_64 = arith.constant 0 : index
    %c0_65 = arith.constant 0 : index
    %73 = vector.load %arg2[%c4_63, %c0_64, %c0_65] : memref<6x1x32xf32, #tpu.memory_space<vmem>>, vector<1x1x32xf32>
    %74 = vector.shape_cast %73 : vector<1x1x32xf32> to vector<1x32xf32>
    %75 = vector.broadcast %74 : vector<1x32xf32> to vector<8x32xf32>
    %76 = arith.addf %72, %75 : vector<8x32xf32>
    %77 = arith.negf %31 : vector<8x32xf32>
    %78 = math.exp %77 : vector<8x32xf32>
    %cst_66 = arith.constant 1.000000e+00 : f32
    %79 = vector.broadcast %cst_66 : f32 to vector<8x32xf32>
    %80 = arith.addf %79, %78 : vector<8x32xf32>
    %81 = arith.divf %79, %80 : vector<8x32xf32>
    %82 = arith.negf %46 : vector<8x32xf32>
    %83 = math.exp %82 : vector<8x32xf32>
    %cst_67 = arith.constant 1.000000e+00 : f32
    %84 = vector.broadcast %cst_67 : f32 to vector<8x32xf32>
    %85 = arith.addf %84, %83 : vector<8x32xf32>
    %86 = arith.divf %84, %85 : vector<8x32xf32>
    %87 = math.tanh %61 : vector<8x32xf32>
    %88 = arith.negf %76 : vector<8x32xf32>
    %89 = math.exp %88 : vector<8x32xf32>
    %cst_68 = arith.constant 1.000000e+00 : f32
    %90 = vector.broadcast %cst_68 : f32 to vector<8x32xf32>
    %91 = arith.addf %90, %89 : vector<8x32xf32>
    %92 = arith.divf %90, %91 : vector<8x32xf32>
    %93 = arith.mulf %86, %7 : vector<8x32xf32>
    %94 = arith.mulf %81, %87 : vector<8x32xf32>
    %95 = arith.addf %93, %94 : vector<8x32xf32>
    %96 = math.tanh %95 : vector<8x32xf32>
    %97 = arith.mulf %92, %96 : vector<8x32xf32>
    %c13 = arith.constant 13 : index
    %c0_69 = arith.constant 0 : index
    %c0_70 = arith.constant 0 : index
    %98 = vector.load %arg1[%c13, %c0_69, %c0_70] : memref<14x32x32xf32, #tpu.memory_space<vmem>>, vector<1x32x32xf32>
    %99 = vector.shape_cast %98 : vector<1x32x32xf32> to vector<32x32xf32>
    %cst_71 = arith.constant dense<0.000000e+00> : vector<8x32xf32>
    %100 = tpu.matmul %97, %99, %cst_71 {dimension_numbers = #tpu.dot_dimension_numbers<[1], [0], [0], [1], [0, 0, 1, 1], [], []>} : vector<8x32xf32>, vector<32x32xf32>, vector<8x32xf32> -> vector<8x32xf32>
    %c5_72 = arith.constant 5 : index
    %c0_73 = arith.constant 0 : index
    %c0_74 = arith.constant 0 : index
    %101 = vector.load %arg2[%c5_72, %c0_73, %c0_74] : memref<6x1x32xf32, #tpu.memory_space<vmem>>, vector<1x1x32xf32>
    %102 = vector.shape_cast %101 : vector<1x1x32xf32> to vector<1x32xf32>
    %103 = vector.broadcast %102 : vector<1x32xf32> to vector<8x32xf32>
    %104 = arith.addf %100, %103 : vector<8x32xf32>
    %105 = tpu.iota {dimensions = array<i32: 1>} : vector<8x32xi32>
    %c4_i32 = arith.constant 4 : i32
    %106 = vector.broadcast %c4_i32 : i32 to vector<8x32xi32>
    %107 = arith.cmpi slt, %105, %106 : vector<8x32xi32>
    %cst_75 = arith.constant 0xFF800000 : f32
    %108 = vector.broadcast %cst_75 : f32 to vector<8x32xf32>
    %109 = arith.select %107, %104, %108 : vector<8x32xi1>, vector<8x32xf32>
    %cst_76 = arith.constant dense<0xFF800000> : vector<8xf32>
    %110 = vector.multi_reduction <maximumf>, %109, %cst_76 [1] : vector<8x32xf32> to vector<8xf32>
    %111 = vector.shape_cast %110 : vector<8xf32> to vector<8x1xf32>
    %112 = vector.broadcast %111 : vector<8x1xf32> to vector<8x32xf32>
    %113 = arith.subf %104, %112 : vector<8x32xf32>
    %114 = math.exp %113 : vector<8x32xf32>
    %cst_77 = arith.constant 0.000000e+00 : f32
    %115 = vector.broadcast %cst_77 : f32 to vector<8x32xf32>
    %116 = arith.select %107, %114, %115 : vector<8x32xi1>, vector<8x32xf32>
    %cst_78 = arith.constant dense<0.000000e+00> : vector<8xf32>
    %117 = vector.multi_reduction <add>, %116, %cst_78 [1] : vector<8x32xf32> to vector<8xf32>
    %118 = vector.shape_cast %117 : vector<8xf32> to vector<8x1xf32>
    %119 = tpu.reciprocal %118 {approx = true} : vector<8x1xf32> -> vector<8x1xf32>
    %120 = vector.broadcast %119 : vector<8x1xf32> to vector<8x32xf32>
    %121 = arith.mulf %116, %120 : vector<8x32xf32>
    %122 = arith.select %107, %121, %104 : vector<8x32xi1>, vector<8x32xf32>
    %c0_79 = arith.constant 0 : index
    %c0_80 = arith.constant 0 : index
    %c0_81 = arith.constant 0 : index
    %123 = vector.load %arg3[%c0_79, %c0_80, %c0_81] : memref<3x8x32xf32, #tpu.memory_space<vmem>>, vector<1x8x32xf32>
    %124 = vector.shape_cast %123 : vector<1x8x32xf32> to vector<8x32xf32>
    %125 = vector.shape_cast %122 : vector<8x32xf32> to vector<1x8x32xf32>
    tpu.vector_store %arg3[%c0_79, %c0_80, %c0_81], %125 {strides = array<i32>} : memref<3x8x32xf32, #tpu.memory_space<vmem>>, vector<1x8x32xf32>,
    %c1_82 = arith.constant 1 : index
    %c0_83 = arith.constant 0 : index
    %c0_84 = arith.constant 0 : index
    %126 = vector.load %arg3[%c1_82, %c0_83, %c0_84] : memref<3x8x32xf32, #tpu.memory_space<vmem>>, vector<1x8x32xf32>
    %127 = vector.shape_cast %126 : vector<1x8x32xf32> to vector<8x32xf32>
    %128 = vector.shape_cast %97 : vector<8x32xf32> to vector<1x8x32xf32>
    tpu.vector_store %arg3[%c1_82, %c0_83, %c0_84], %128 {strides = array<i32>} : memref<3x8x32xf32, #tpu.memory_space<vmem>>, vector<1x8x32xf32>,
    %c2_85 = arith.constant 2 : index
    %c0_86 = arith.constant 0 : index
    %c0_87 = arith.constant 0 : index
    %129 = vector.load %arg3[%c2_85, %c0_86, %c0_87] : memref<3x8x32xf32, #tpu.memory_space<vmem>>, vector<1x8x32xf32>
    %130 = vector.shape_cast %129 : vector<1x8x32xf32> to vector<8x32xf32>
    %131 = vector.shape_cast %95 : vector<8x32xf32> to vector<1x8x32xf32>
    tpu.vector_store %arg3[%c2_85, %c0_86, %c0_87], %131 {strides = array<i32>} : memref<3x8x32xf32, #tpu.memory_space<vmem>>, vector<1x8x32xf32>,
    return
  }
}

</mosaic_0001>

<bundles_post_ra>
// kernel: tpu_custom_call.1
= control target key start
LH: loop header
LB: loop body
LE: loop exit
PB: predicated region body
PF: predicated region fallthrough
CT: control target
= control target key end

     0   :  { %8 = vsyncpa [#allocation3], 0  ;;  %s1864_s0 = inlined_call_operand.hbm [shape: f32[4,8,32], index: 0, kind: input, shape index: {}]   ;;  %s1865_s1 = inlined_call_operand.hbm [shape: f32[14,32,32], index: 1, kind: input, shape index: {}]   ;;  %s1866_s2 = inlined_call_operand.vmem [shape: f32[6,1,32], index: 2, kind: input, shape index: {}]   ;;  %s1867_s3 = inlined_call_operand.hbm [shape: f32[3,8,32], index: 3, kind: output, shape index: {}]  }
   0x1   :  { %9 = vsyncpa [#allocation6], 0 }
   0x2   :  { %10 = vsyncpa [#allocation4], 0  ;;  %s1671_s12 = smov [#allocation2]   ;;  %s1599_s16 = scalar_lea.hbm %s1864_s0, 512 }
   0x3   :  { %s16_s13 = sshll.u32 %s1671_s12, 4  ;;  %p1600_p0 = scmp.ne.s32.totalorder %s1864_s0, %s1599_s16  ;;  %s17_s13 = int_to_ptr.vmem [resolvable:$true] %s16_s13 }
   0x4   :  { %p1603_p1 = scmp.lt.u32.totalorder %s1599_s16, %s1864_s0 }
   0x6   :  { %p1605_p2 = pnand %p1603_p1, %p1600_p0 }
   0x8   :  { %1608 = shalt.err (!%p1605_p2)
}
   0x9   :  { %s1609_s21 = scalar_lea.vmem %s17_s13, 512  ;;  %p1614_p4 = scmp.lt.s32.totalorder %s17_s13, %s17_s13 }
   0xa   :  { %p1610_p3 = scmp.ne.s32.totalorder %s17_s13, %s1609_s21  ;;  %p1615_p5 = scmp.lt.s32.totalorder %s1609_s21, %s1609_s21 }
   0xc   :  { %p1616_p6 = por %p1615_p5, %p1614_p4 }
   0xe   :  { %p1617_p7 = pnand %p1616_p6, %p1610_p3 }
  0x10   :  { %1620 = shalt.err (!%p1617_p7)
}
  0x11   :  { %s1672_s22 = smov 128   ;;  %s1673_s23 = smov 8  }
  0x12   :  { %22 = dma.hbm_to_vmem [thread:$0]  %s1864_s0, 512, %s17_s13, [#allocation3], %s1672_s22, %s1672_s22, %s1673_s23  }
  0x13   :  { %s1674_s26 = smov [#allocation5]   ;;  %s1621_s30 = scalar_lea.hbm %s1865_s1, 7168 }
  0x14   :  { %s28_s27 = sshll.u32 %s1674_s26, 4  ;;  %p1622_p8 = scmp.ne.s32.totalorder %s1865_s1, %s1621_s30  ;;  %s29_s27 = int_to_ptr.vmem [resolvable:$true] %s28_s27 }
  0x15   :  { %p1625_p9 = scmp.lt.u32.totalorder %s1621_s30, %s1865_s1 }
  0x17   :  { %p1627_p10 = pnand %p1625_p9, %p1622_p8 }
  0x19   :  { %1630 = shalt.err (!%p1627_p10)
}
  0x1a   :  { %s1631_s8 = scalar_lea.vmem %s29_s27, 7168  ;;  %p1636_p12 = scmp.lt.s32.totalorder %s29_s27, %s29_s27 }
  0x1b   :  { %p1632_p11 = scmp.ne.s32.totalorder %s29_s27, %s1631_s8  ;;  %p1637_p13 = scmp.lt.s32.totalorder %s1631_s8, %s1631_s8 }
  0x1d   :  { %p1638_p0 = por %p1637_p13, %p1636_p12 }
  0x1f   :  { %p1639_p1 = pnand %p1638_p0, %p1632_p11 }
  0x21   :  { %1642 = shalt.err (!%p1639_p1)
}
  0x22   :  { %34 = dma.hbm_to_vmem [thread:$0]  %s1865_s1, 7168, %s29_s27, [#allocation6], %s1672_s22, %s1672_s22, %s1673_s23  }
  0x23   :  { %1665 = dma.done.wait [#allocation3], 512  }
  0x24   :  { %1666 = vsyncadd [#allocation3], 4294966784 }
  0x25   :  { %1667 = dma.done.wait [#allocation6], 7168  }
  0x26   :  { %1668 = vsyncadd [#allocation6], 4294960128  ;;  %v1675_v0 = vmov 0.0|0.0   ;;  %vm1676_vm0 = vmmov 0   ;;  %v1677_v1 = vmov 0.0   ;;  %v50_v2 = vld [vmem:[#allocation5] sm:$0xff] }
  0x27   :  { %1487 = vmatprep.subr.bf16.mxu0 %v1675_v0  ;;  %1341 = vmatprep.mubr.msk.f32.mxu0 %vm1676_vm0, %v1677_v1  ;;  %v51_v3 = vld [vmem:[#allocation5 + $0x8] sm:$0xff]  ;;  %v52_v4 = vld [vmem:[#allocation5 + $0x10] sm:$0xff]  ;;  %v53_v6 = vld [vmem:[#allocation5 + $0x18] sm:$0xff]  ;;  %vm61_vm1 = vcmask 261120  }
  0x28   :  { %1493 = vmatprep.subr.bf16.mxu1 %v1675_v0  ;;  %1352 = vmatprep.mubr.msk.f32.mxu1 %vm1676_vm0, %v1677_v1  ;;  %v1488_v5 = vpack.c.bf16 %v51_v3, %v50_v2  ;;  %v142_v7 = vld [vmem:[#allocation5 + $0xa0] sm:$0xff]  ;;  %v143_v8 = vld [vmem:[#allocation5 + $0xa8] sm:$0xff]  ;;  %v144_v9 = vld [vmem:[#allocation5 + $0xb0] sm:$0xff]  ;;  %v1491_v11 = vpack.c.bf16 %v53_v6, %v52_v4 }
  0x29   :  { %v145_v10 = vld [vmem:[#allocation5 + $0xb8] sm:$0xff]  ;;  %v1494_v12 = vpack.c.bf16 %v143_v8, %v142_v7  ;;  %v137_v13 = vld [vmem:[#allocation5 + $0x20] sm:$0xff]  ;;  %v138_v15 = vld [vmem:[#allocation5 + $0x28] sm:$0xff] }
  0x2a   :  { %1489 = vmatpush3.bf16.msra.mxu0 %v1488_v5  ;;  %v1497_v14 = vpack.c.bf16 %v145_v10, %v144_v9  ;;  %v293_v16 = vld [vmem:[#allocation5 + $0x120] sm:$0xff]  ;;  %v294_v17 = vld [vmem:[#allocation5 + $0x128] sm:$0xff]  ;;  %v1500_v19 = vpack.c.bf16 %v138_v15, %v137_v13  ;;  %v295_v22 = vld [vmem:[#allocation5 + $0x130] sm:$0xff] }
  0x2b   :  { %1490 = vmatprep.subr.bf16.mxu0 %v1675_v0  ;;  %1495 = vmatpush3.bf16.msra.mxu1 %v1494_v12  ;;  %v43_v18 = vld [vmem:[#allocation2] sm:$0xff]  ;;  %v1738_v20 = vld [vmem:[#allocation2 + $0x8] sm:$0xff]  ;;  %v1506_v21 = vpack.c.bf16 %v294_v17, %v293_v16  ;;  %v296_v23 = vld [vmem:[#allocation5 + $0x138] sm:$0xff] }
  0x2c   :  { %1496 = vmatprep.subr.bf16.mxu1 %v1675_v0  ;;  %v1509_v24 = vpack.c.bf16 %v296_v23, %v295_v22  ;;  %v381_v25 = vld [vmem:[#allocation5 + $0x40] sm:$0xff]  ;;  %v382_v26 = vld [vmem:[#allocation5 + $0x48] sm:$0xff]  ;;  %v1750_v27 = vld [vmem:[#allocation2 + $0x10] sm:$0xff] }
  0x2d   :  { %v1518_v28 = vpack.c.bf16 %v382_v26, %v381_v25  ;;  %v139_v29 = vld [vmem:[#allocation5 + $0x30] sm:$0xff]  ;;  %v140_v30 = vld [vmem:[#allocation5 + $0x38] sm:$0xff]  ;;  %v1235_v35 = vld [vmem:[%s1866_s2] ss:$0 sm:$0xff] }
  0x2e   :  { %1492 = vmatpush3.bf16.msra.mxu0 %v1491_v11  ;;  %v383_v31 = vld [vmem:[#allocation5 + $0x50] sm:$0xff]  ;;  %v1503_v32 = vpack.c.bf16 %v140_v30, %v139_v29  ;;  %v384_v33 = vld [vmem:[#allocation5 + $0x58] sm:$0xff]  ;;  %v386_v36 = vld [vmem:[#allocation5 + $0xc0] sm:$0xff] }
  0x2f   :  { %1499 = vmatprep.subr.bf16.mxu0 %v1675_v0  ;;  %1498 = vmatpush3.bf16.msra.mxu1 %v1497_v14  ;;  %v1521_v34 = vpack.c.bf16 %v384_v33, %v383_v31  ;;  %v387_v37 = vld [vmem:[#allocation5 + $0xc8] sm:$0xff]  ;;  %v621_v38 = vld [vmem:[#allocation5 + $0xe0] sm:$0xff]  ;;  %v388_v45 = vld [vmem:[#allocation5 + $0xd0] sm:$0xff] }
  0x30   :  { %1505 = vmatprep.subr.bf16.mxu1 %v1675_v0  ;;  %v622_v39 = vld [vmem:[#allocation5 + $0xe8] sm:$0xff]  ;;  %v1512_v43 = vpack.c.bf16 %v387_v37, %v386_v36  ;;  %v389_v48 = vld [vmem:[#allocation5 + $0xd8] sm:$0xff]  ;;  %v623_v49 = vld [vmem:[#allocation5 + $0xf0] sm:$0xff] }
  0x31   :  { %1342 = vmatmul.mubr.msk.f32.vlgmr.msra.gmra.mrb[0].mxu0 %vm61_vm1, %v43_v18  ;;  %v1530_v44 = vpack.c.bf16 %v622_v39, %v621_v38  ;;  %v624_v50 = vld [vmem:[#allocation5 + $0xf8] sm:$0xff]  ;;  %v1515_v52 = vpack.c.bf16 %v389_v48, %v388_v45  ;;  %v531_v54 = vld [vmem:[#allocation5 + $0x140] sm:$0xff]  ;;  %v532_v55 = vld [vmem:[#allocation5 + $0x148] sm:$0xff] }
  0x32   :  { %1501 = vmatpush3.bf16.msra.mxu0 %v1500_v19  ;;  %1363 = vmatprep.mubr.msk.f32.mxu0 %vm1676_vm0, %v1677_v1  ;;  %v1533_v53 = vpack.c.bf16 %v624_v50, %v623_v49  ;;  %v766_v56 = vld [vmem:[#allocation5 + $0x160] sm:$0xff]  ;;  %v767_v57 = vld [vmem:[#allocation5 + $0x168] sm:$0xff]  ;;  %v1524_v58 = vpack.c.bf16 %v532_v55, %v531_v54  ;;  %v533_v60 = vld [vmem:[#allocation5 + $0x150] sm:$0xff] }
  0x33   :  { %1353 = vmatmul.mubr.msk.f32.vlgmr.msra.gmra.mrb[0].mxu1 %vm61_vm1, %v1738_v20  ;;  %1502 = vmatprep.subr.bf16.mxu0 %v1675_v0  ;;  %v1542_v59 = vpack.c.bf16 %v767_v57, %v766_v56  ;;  %v534_v62 = vld [vmem:[#allocation5 + $0x158] sm:$0xff]  ;;  %v768_v63 = vld [vmem:[#allocation5 + $0x170] sm:$0xff]  ;;  %v616_v6 = vld [vmem:[#allocation5 + $0x60] sm:$0xff] }
  0x34   :  { %1507 = vmatpush3.bf16.msra.mxu1 %v1506_v21  ;;  %1374 = vmatprep.mubr.msk.f32.mxu1 %vm1676_vm0, %v1677_v1  ;;  %v769_v2 = vld [vmem:[#allocation5 + $0x178] sm:$0xff]  ;;  %v1527_v4 = vpack.c.bf16 %v534_v62, %v533_v60  ;;  %v617_v7 = vld [vmem:[#allocation5 + $0x68] sm:$0xff]  ;;  %v851_v8 = vld [vmem:[#allocation5 + $0x80] sm:$0xff] }
  0x35   :  { %1508 = vmatprep.subr.bf16.mxu1 %v1675_v0  ;;  %v1545_v5 = vpack.c.bf16 %v769_v2, %v768_v63  ;;  %v852_v9 = vld [vmem:[#allocation5 + $0x88] sm:$0xff]  ;;  %v1536_v10 = vpack.c.bf16 %v617_v7, %v616_v6  ;;  %v618_v12 = vld [vmem:[#allocation5 + $0x70] sm:$0xff]  ;;  %v619_v13 = vld [vmem:[#allocation5 + $0x78] sm:$0xff] }
  0x36   :  { %1504 = vmatpush3.bf16.msra.mxu0 %v1503_v32  ;;  %v1554_v11 = vpack.c.bf16 %v852_v9, %v851_v8  ;;  %v853_v14 = vld [vmem:[#allocation5 + $0x90] sm:$0xff]  ;;  %v854_v15 = vld [vmem:[#allocation5 + $0x98] sm:$0xff]  ;;  %v1539_v16 = vpack.c.bf16 %v619_v13, %v618_v12  ;;  %v856_v18 = vld [vmem:[#allocation5 + $0x100] sm:$0xff] }
  0x37   :  { %1511 = vmatprep.subr.bf16.mxu0 %v1675_v0  ;;  %v1557_v17 = vpack.c.bf16 %v854_v15, %v853_v14  ;;  %v857_v19 = vld [vmem:[#allocation5 + $0x108] sm:$0xff]  ;;  %v858_v22 = vld [vmem:[#allocation5 + $0x110] sm:$0xff]  ;;  %v859_v23 = vld [vmem:[#allocation5 + $0x118] sm:$0xff] }
  0x38   :  { %1510 = vmatpush3.bf16.msra.mxu1 %v1509_v24  ;;  %v1548_v21 = vpack.c.bf16 %v857_v19, %v856_v18  ;;  %v1551_v24 = vpack.c.bf16 %v859_v23, %v858_v22  ;;  %v1001_v25 = vld [vmem:[#allocation5 + $0x180] sm:$0xff]  ;;  %v1002_v26 = vld [vmem:[#allocation5 + $0x188] sm:$0xff]  ;;  %v1003_v29 = vld [vmem:[#allocation5 + $0x190] sm:$0xff] }
  0x39   :  { %1517 = vmatprep.subr.bf16.mxu1 %v1675_v0  ;;  %v1004_v30 = vld [vmem:[#allocation5 + $0x198] sm:$0xff]  ;;  %v1110_v32 = vld [vmem:[#allocation5 + $0x1a0] sm:$0xff]  ;;  %v1111_v33 = vld [vmem:[#allocation5 + $0x1a8] sm:$0xff] }
  0x3a   :  { %v1563_v31 = vpack.c.bf16 %v1004_v30, %v1003_v29  ;;  %v1113_v36 = vld [vmem:[#allocation5 + $0x1b8] sm:$0xff]  ;;  %v1251_v63 = vld [vmem:[%s1866_s2 + $0x3] ss:$0 sm:$0xff]  ;;  %v1195_v29 = vlaneseq }
  0x3b   :  { %1375 = vmatmul.mubr.msk.f32.vlgmr.msra.gmra.mrb[2].mxu1 %vm61_vm1, %v1750_v27 }
  0x3c   :  { %1519 = vmatpush3.bf16.msra.mxu1 %v1518_v28  ;;  %1396 = vmatprep.mubr.msk.f32.mxu1 %vm1676_vm0, %v1677_v1  ;;  %v1560_v28 = vpack.c.bf16 %v1002_v26, %v1001_v25  ;;  %v1196_v30 = vand.u32 127, %v1195_v29 }
  0x3d   :  { %1520 = vmatprep.subr.bf16.mxu1 %v1675_v0 }
  0x3e   :  { %vm1197_vm2 = vcmp.lt.s32.totalorder %v1196_v30, 4 }
  0x40   :  { %1522 = vmatpush3.bf16.msra.mxu1 %v1521_v34  ;;  %v1112_v34 = vld [vmem:[#allocation5 + $0x1b0] sm:$0xff] }
  0x41   :  { %1529 = vmatprep.subr.bf16.mxu1 %v1675_v0  ;;  %v1569_v37 = vpack.c.bf16 %v1113_v36, %v1112_v34 }
 0x104   :  { %v131_v40 = vpop.f32.mrb[0].mxu0 }
 0x105   :  { %v132_v41 = vadd.f32 %v1235_v35, %v131_v40  ;;  %v1343_v42 = vpop.f32.mrb[1].mxu0  ;;  %v1566_v35 = vpack.c.bf16 %v1111_v33, %v1110_v32 }
 0x106   :  { %v1763_v46 = vpop.f32.mrb[0].mxu1 }
 0x107   :  { %v1765_v47 = vmax.f32 %v132_v41, 0.0  ;;  %v1354_v51 = vpop.f32.mrb[1].mxu1 }
 0x109   :  { %1364 = vmatmul.mubr.msk.f32.vlgmr.msra.gmra.mrb[2].mxu0 %vm61_vm1, %v1765_v47  ;;  %1397 = vmatmul.mubr.msk.f32.vlgmr.msra.gmra.mrb[4].mxu1 %vm61_vm1, %v1765_v47 }
 0x10a   :  { %1513 = vmatpush3.bf16.msra.mxu0 %v1512_v43  ;;  %1531 = vmatpush3.bf16.msra.mxu1 %v1530_v44 }
 0x10b   :  { %1514 = vmatprep.subr.bf16.mxu0 %v1675_v0  ;;  %1532 = vmatprep.subr.bf16.mxu1 %v1675_v0 }
 0x10c   :  { %1385 = vmatprep.mubr.msk.f32.mxu0 %vm1676_vm0, %v1677_v1  ;;  %1418 = vmatprep.mubr.msk.f32.mxu1 %vm1676_vm0, %v1677_v1 }
 0x10e   :  { %1516 = vmatpush3.bf16.msra.mxu0 %v1515_v52  ;;  %1534 = vmatpush3.bf16.msra.mxu1 %v1533_v53  ;;  %v1777_v61 = vpop.f32.mrb[2].mxu1 }
 0x10f   :  { %1523 = vmatprep.subr.bf16.mxu0 %v1675_v0  ;;  %1541 = vmatprep.subr.bf16.mxu1 %v1675_v0  ;;  %v1376_v3 = vpop.f32.mrb[3].mxu1 }
 0x111   :  { %1386 = vmatmul.mubr.msk.f32.vlgmr.msra.gmra.mrb[4].mxu0 %vm61_vm1, %v1738_v20  ;;  %1419 = vmatmul.mubr.msk.f32.vlgmr.msra.gmra.mrb[6].mxu1 %vm61_vm1, %v1738_v20 }
 0x112   :  { %1525 = vmatpush3.bf16.msra.mxu0 %v1524_v58  ;;  %1543 = vmatpush3.bf16.msra.mxu1 %v1542_v59 }
 0x113   :  { %1526 = vmatprep.subr.bf16.mxu0 %v1675_v0  ;;  %1544 = vmatprep.subr.bf16.mxu1 %v1675_v0 }
 0x114   :  { %1407 = vmatprep.mubr.msk.f32.mxu0 %vm1676_vm0, %v1677_v1  ;;  %1440 = vmatprep.mubr.msk.f32.mxu1 %vm1676_vm0, %v1677_v1 }
 0x116   :  { %1528 = vmatpush3.bf16.msra.mxu0 %v1527_v4  ;;  %1546 = vmatpush3.bf16.msra.mxu1 %v1545_v5 }
 0x117   :  { %1535 = vmatprep.subr.bf16.mxu0 %v1675_v0  ;;  %1553 = vmatprep.subr.bf16.mxu1 %v1675_v0 }
 0x119   :  { %1408 = vmatmul.mubr.msk.f32.vlgmr.msra.gmra.mrb[6].mxu0 %vm61_vm1, %v1750_v27  ;;  %1441 = vmatmul.mubr.msk.f32.vlgmr.msra.gmra.mrb[8].mxu1 %vm61_vm1, %v1750_v27 }
 0x11a   :  { %1537 = vmatpush3.bf16.msra.mxu0 %v1536_v10  ;;  %1555 = vmatpush3.bf16.msra.mxu1 %v1554_v11  ;;  %v1256_v11 = vld [vmem:[%s1866_s2 + $0x4] ss:$0 sm:$0xff] }
 0x11b   :  { %1538 = vmatprep.subr.bf16.mxu0 %v1675_v0  ;;  %1556 = vmatprep.subr.bf16.mxu1 %v1675_v0 }
 0x11c   :  { %1429 = vmatprep.mubr.msk.f32.mxu0 %vm1676_vm0, %v1677_v1  ;;  %1462 = vmatprep.mubr.msk.f32.mxu1 %vm1676_vm0, %v1677_v1 }
 0x11e   :  { %1540 = vmatpush3.bf16.msra.mxu0 %v1539_v16  ;;  %1558 = vmatpush3.bf16.msra.mxu1 %v1557_v17  ;;  %v49_v17 = vld [vmem:[#allocation2 + $0x18] sm:$0xff] }
 0x11f   :  { %1547 = vmatprep.subr.bf16.mxu0 %v1675_v0  ;;  %1565 = vmatprep.subr.bf16.mxu1 %v1675_v0 }
 0x121   :  { %1430 = vmatmul.mubr.msk.f32.vlgmr.msra.gmra.mrb[8].mxu0 %vm61_vm1, %v1765_v47  ;;  %1463 = vmatmul.mubr.msk.f32.vlgmr.msra.gmra.mrb[10].mxu1 %vm61_vm1, %v1765_v47 }
 0x122   :  { %1549 = vmatpush3.bf16.msra.mxu0 %v1548_v21  ;;  %1451 = vmatprep.mubr.msk.f32.mxu0 %vm1676_vm0, %v1677_v1 }
 0x123   :  { %1550 = vmatprep.subr.bf16.mxu0 %v1675_v0  ;;  %1484 = vmatprep.mubr.msk.f32.mxu1 %vm1676_vm0, %v1677_v1 }
 0x124   :  { %1567 = vmatpush3.bf16.msra.mxu1 %v1566_v35 }
 0x125   :  { %1568 = vmatprep.subr.bf16.mxu1 %v1675_v0 }
 0x126   :  { %1552 = vmatpush3.bf16.msra.mxu0 %v1551_v24 }
 0x127   :  { %1559 = vmatprep.subr.bf16.mxu0 %v1675_v0 }
 0x128   :  { %1570 = vmatpush3.bf16.msra.mxu1 %v1569_v37 }
 0x129   :  { %1452 = vmatmul.mubr.msk.f32.vlgmr.msra.gmra.mrb[10].mxu0 %vm61_vm1, %v1738_v20 }
 0x12a   :  { %1561 = vmatpush3.bf16.msra.mxu0 %v1560_v28  ;;  %1473 = vmatprep.mubr.msk.f32.mxu0 %vm1676_vm0, %v1677_v1 }
 0x12b   :  { %1562 = vmatprep.subr.bf16.mxu0 %v1675_v0 }
 0x12e   :  { %1564 = vmatpush3.bf16.msra.mxu0 %v1563_v31  ;;  %v1261_v31 = vld [vmem:[%s1866_s2 + $0x5] ss:$0 sm:$0xff] }
 0x131   :  { %1474 = vmatmul.mubr.msk.f32.vlgmr.msra.gmra.mrb[12].mxu0 %vm61_vm1, %v1750_v27  ;;  %v1241_v27 = vld [vmem:[%s1866_s2 + $0x1] ss:$0 sm:$0xff] }
 0x1dc   :  { %v288_v20 = vpop.f32.mrb[2].mxu0  ;;  %v526_v38 = vpop.f32.mrb[4].mxu1 }
 0x1dd   :  { %v289_v1 = vadd.f32 %v288_v20, %v1763_v46  ;;  %v1365_v39 = vpop.f32.mrb[3].mxu0  ;;  %v1398_v40 = vpop.f32.mrb[5].mxu1  ;;  %v1246_v46 = vld [vmem:[%s1866_s2 + $0x2] ss:$0 sm:$0xff]  ;;  %s1678_s2 = smov [#allocation7]  }
 0x1de   :  { %s1222_s21 = sshll.u32 %s1678_s2, 4  ;;  %s1223_s21 = int_to_ptr.vmem [resolvable:$true] %s1222_s21 }
 0x1df   :  { %v370_v41 = vadd.f32 %v1777_v61, %v289_v1  ;;  %s1643_s24 = scalar_lea.vmem %s1223_s21, 384  ;;  %p1648_p3 = scmp.lt.s32.totalorder %s1223_s21, %s1223_s21 }
 0x1e0   :  { %p1644_p2 = scmp.ne.s32.totalorder %s1223_s21, %s1643_s24  ;;  %p1649_p4 = scmp.lt.s32.totalorder %s1643_s24, %s1643_s24 }
 0x1e1   :  { %v379_v42 = vadd.f32 %v1241_v27, %v370_v41 }
 0x1e2   :  { %p1650_p5 = por %p1649_p4, %p1648_p3 }
 0x1e3   :  { %v1257_v45 = vmul.f32 -1.442695, %v379_v42 }
 0x1e4   :  { %v456_v43 = vpop.f32.mrb[4].mxu0  ;;  %v691_v44 = vpop.f32.mrb[6].mxu1  ;;  %p1651_p6 = pnand %p1650_p5, %p1644_p2 }
 0x1e5   :  { %v527_v47 = vadd.f32 %v526_v38, %v456_v43  ;;  %v1387_v48 = vpop.f32.mrb[5].mxu0  ;;  %v1420_v0 = vpop.f32.mrb[7].mxu1  ;;  %1579 = vpow2.f32 %v1257_v45 }
 0x1ec   :  { %v601_v49 = vpop.f32.mrb[6].mxu0  ;;  %v836_v50 = vpop.f32.mrb[8].mxu1 }
 0x1ed   :  { %v605_v51 = vadd.f32 %v601_v49, %v527_v47  ;;  %v1409_v52 = vpop.f32.mrb[7].mxu0  ;;  %v1442_v53 = vpop.f32.mrb[9].mxu1 }
 0x1ef   :  { %v614_v54 = vadd.f32 %v1246_v46, %v605_v51  ;;  %v1580_v56 = vpop.eup %1579 }
 0x1f0   :  { %v1088_v62 = vadd.f32 1.0, %v1580_v56 }
 0x1f1   :  { %v1258_v55 = vmul.f32 -1.442695, %v614_v54 }
 0x1f3   :  { %1581 = vpow2.f32 %v1258_v55 }
 0x1f4   :  { %v761_v57 = vpop.f32.mrb[8].mxu0  ;;  %v996_v58 = vpop.f32.mrb[10].mxu1  ;;  %1583 = vrcp.f32 %v1088_v62 }
 0x1f5   :  { %v762_v59 = vadd.f32 %v761_v57, %v691_v44  ;;  %v1431_v60 = vpop.f32.mrb[9].mxu0  ;;  %v1464_v61 = vpop.f32.mrb[11].mxu1 }
 0x1f7   :  { %v840_v2 = vadd.f32 %v836_v50, %v762_v59 }
 0x1f9   :  { %v849_v3 = vadd.f32 %v1251_v63, %v840_v2 }
 0x1fb   :  { %1585 = vtanh.f32 %v849_v3 }
 0x1fc   :  { %v926_v4 = vpop.f32.mrb[10].mxu0 }
 0x1fd   :  { %v1582_v5 = vpop.eup %1581  ;;  %v997_v6 = vadd.f32 %v996_v58, %v926_v4  ;;  %v1453_v7 = vpop.f32.mrb[11].mxu0 }
 0x1fe   :  { %v1094_v8 = vadd.f32 1.0, %v1582_v5  ;;  %v1584_v9 = vpop.eup %1583 }
 0x200   :  { %1587 = vrcp.f32 %v1094_v8 }
 0x204   :  { %v1071_v10 = vpop.f32.mrb[12].mxu0 }
 0x205   :  { %v1586_v12 = vpop.eup %1585  ;;  %v1075_v13 = vadd.f32 %v1071_v10, %v997_v6  ;;  %v1475_v14 = vpop.f32.mrb[13].mxu0 }
 0x206   :  { %v1105_v15 = vmul.f32 %v1586_v12, %v1584_v9 }
 0x207   :  { %v1084_v16 = vadd.f32 %v1256_v11, %v1075_v13 }
 0x209   :  { %v1259_v18 = vmul.f32 -1.442695, %v1084_v16 }
 0x20a   :  { %v1588_v19 = vpop.eup %1587 }
 0x20b   :  { %v1104_v21 = vmul.f32 %v1588_v19, %v49_v17  ;;  %1589 = vpow2.f32 %v1259_v18 }
 0x20d   :  { %v1106_v22 = vadd.f32 %v1105_v15, %v1104_v21 }
 0x20f   :  { %1216 = vst.msk [vmem:[#allocation7 + $0x10] sm:$0xff] %vm61_vm1, %v1106_v22  ;;  %1591 = vtanh.f32 %v1106_v22 }
 0x215   :  { %v1590_v23 = vpop.eup %1589 }
 0x216   :  { %v1101_v24 = vadd.f32 1.0, %v1590_v23 }
 0x218   :  { %1593 = vrcp.f32 %v1101_v24 }
 0x219   :  { %v1592_v25 = vpop.eup %1591 }
 0x222   :  { %v1594_v26 = vpop.eup %1593 }
 0x223   :  { %v1108_v28 = vmul.f32 %v1594_v26, %v1592_v25 }
 0x225   :  { %1485 = vmatmul.mubr.msk.f32.vlgmr.msra.gmra.mrb[12].mxu1 %vm61_vm1, %v1108_v28  ;;  %1214 = vst.msk [vmem:[#allocation7 + $0x8] sm:$0xff] %vm61_vm1, %v1108_v28 }
 0x2f8   :  { %v1191_v32 = vpop.f32.mrb[12].mxu1 }
 0x2f9   :  { %v1192_v33 = vadd.f32 %v1261_v31, %v1191_v32  ;;  %v1486_v34 = vpop.f32.mrb[13].mxu1 }
 0x2fb   :  { %v1198_v35 = vsel %vm1197_vm2, %v1192_v33, -inf }
 0x2fc   :  { %v1199_v36 = vsel %vm61_vm1, %v1198_v35, -inf }
 0x2fd   :  { %1200 = vmax.xlane.f32.xlu0 %v1199_v36 }
 0x38a   :  { %v1201_v37 = vpop.xlane.xlu0 %1200 }
 0x38b   :  { %v1202_v20 = vsub.f32 %v1192_v33, %v1201_v37 }
 0x38d   :  { %v1203_v38 = vmul.f32 1.442695, %v1202_v20 }
 0x38f   :  { %1595 = vpow2.f32 %v1203_v38 }
 0x399   :  { %v1596_v1 = vpop.eup %1595 }
 0x39a   :  { %v1205_v39 = vsel %vm1197_vm2, %v1596_v1, 0.0 }
 0x39b   :  { %v1206_v40 = vsel %vm61_vm1, %v1205_v39, 0.0 }
 0x39c   :  { %1207 = vadd.xlane.f32.xlu0 %v1206_v40 }
 0x429   :  { %v1208_v27 = vpop.xlane.xlu0 %1207 }
 0x42a   :  { %1597 = vrcp.f32 %v1208_v27 }
 0x434   :  { %v1598_v41 = vpop.eup %1597 }
 0x435   :  { %v1210_v42 = vmul.f32 %v1598_v41, %v1205_v39 }
 0x437   :  { %v1211_v43 = vsel %vm1197_vm2, %v1210_v42, %v1192_v33 }
 0x438   :  { %1212 = vst.msk [vmem:[#allocation7] sm:$0xff] %vm61_vm1, %v1211_v43 }
 0x439   :  { %1654 = shalt.err (!%p1651_p6)
}
 0x43a   :  { %s1655_s27 = scalar_lea.hbm %s1867_s3, 384 }
 0x43b   :  { %p1656_p7 = scmp.ne.s32.totalorder %s1867_s3, %s1655_s27  ;;  %p1659_p8 = scmp.lt.u32.totalorder %s1655_s27, %s1867_s3 }
 0x43d   :  { %p1661_p9 = pnand %p1659_p8, %p1656_p7 }
 0x43f   :  { %1664 = shalt.err (!%p1661_p9)
}
 0x440   :  { %1228 = dma.vmem_to_hbm [thread:$0]  %s1223_s21, 384, %s1867_s3, [#allocation4], %s1672_s22, %s1672_s22, %s1673_s23  }
 0x441   :  { %1669 = dma.done.wait [#allocation4], 384  }
 0x442   :  { %1670 = vsyncadd [#allocation4], 4294966912 }
 0x443   :  { %1232 = vsyncpa [#allocation3], 1 }
 0x444   :  { %1233 = vsyncpa [#allocation6], 1 }
 0x445   :  { %1234 = vsyncpa [#allocation4], 1 }

</bundles_post_ra>
